<compile_context>
chip_gen: v7x
topology: tpu7x:2x2x1
jax: 0.10.0
libtpu: 0.0.40
codegen_flags: <defaults>
</compile_context>

<pallas_src>
import jax
import jax.numpy as jnp
from jax.experimental import pallas as pl
from jax.experimental.pallas import tpu as pltpu

STATE_DIM = 342
STATE_DIM_PAD = 384        # 3 * 128 (padded contraction dim for fc1)
HIDDEN = 64
HIDDEN_PAD = 128           # padded lane width for hidden activations
N_ACTIONS = 43
HEAD_PAD = 128             # fused lane-dense head: logits in [0:43], value at VALUE_LANE
VALUE_LANE = 64
NEG_INF = -1000000000.0
MAX_TILE_B = 1024          # batch tile cap (fits comfortably in v7x 64 MiB VMEM)


def _actor_critic_kernel(x_ref, mask_ref, w1_ref, w2_ref, w3_ref, w4_ref, b_ref, out_ref):
    x = x_ref[...]                                              # (TB, 384)
    mask = mask_ref[...]                                        # (TB, 128), zeros beyond lane 42

    b1 = b_ref[0:1, :]
    b2 = b_ref[1:2, :]
    b3 = b_ref[2:3, :]
    b4 = b_ref[3:4, :]

    # fc1 + relu  (padded lanes >= 64 stay exactly 0)
    h = jnp.maximum(
        jnp.dot(x, w1_ref[...], preferred_element_type=jnp.float32) + b1, 0.0)
    # fc2 + relu
    h = jnp.maximum(
        jnp.dot(h, w2_ref[...], preferred_element_type=jnp.float32) + b2, 0.0)
    # fused fc3a|fc3b + relu: lanes [0:64] actor features, [64:128] critic features
    h3 = jnp.maximum(
        jnp.dot(h, w3_ref[...], preferred_element_type=jnp.float32) + b3, 0.0)
    # fused block-diagonal head: lanes [0:43] = actor logits, lane VALUE_LANE = critic value
    head = jnp.dot(h3, w4_ref[...], preferred_element_type=jnp.float32) + b4  # (TB, 128)

    # masked softmax over the padded action lanes.  Padded mask lanes are 0 so they
    # get -1e9 and underflow to exactly 0 after exp (same math as PyTorch masked_fill).
    logits = jnp.where(mask == 0.0, jnp.float32(NEG_INF), head)
    m = jnp.max(logits, axis=-1, keepdims=True)
    e = jnp.exp(logits - m)
    denom = jnp.sum(e, axis=-1, keepdims=True)
    probs = e * pl.reciprocal(denom, approx=False)              # EUP reciprocal, frees VPU

    # Single lane-dense store: probs everywhere, critic value spliced into lane VALUE_LANE
    # (its prob there is exactly 0 since that lane is masked).
    lane = jax.lax.broadcasted_iota(jnp.int32, head.shape, 1)
    out_ref[...] = jnp.where(lane == VALUE_LANE, head, probs)


def init_params(key):
    """Deterministic synthetic parameters with the PyTorch module's shapes.

    Weights stored as (in_dim, out_dim) (transposed vs nn.Linear), biases (1, out_dim)."""
    dims = [
        ("fc1", STATE_DIM, HIDDEN),
        ("fc2", HIDDEN, HIDDEN),
        ("fc3a", HIDDEN, HIDDEN),
        ("fc3b", HIDDEN, HIDDEN),
        ("fc4a", HIDDEN, N_ACTIONS),
        ("fc4b", HIDDEN, 1),
    ]
    params = {}
    for name, din, dout in dims:
        key, kw, kb = jax.random.split(key, 3)
        bound = 1.0 / jnp.sqrt(jnp.float32(din))
        params[name + "_w"] = jax.random.uniform(
            kw, (din, dout), jnp.float32, minval=-bound, maxval=bound)
        params[name + "_b"] = jax.random.uniform(
            kb, (1, dout), jnp.float32, minval=-bound, maxval=bound)
    return params


def pack_params(params):
    """Zero-pad + fuse the six Linear layers into four lane-dense matmuls + one bias stack."""
    w1 = jnp.zeros((STATE_DIM_PAD, HIDDEN_PAD), jnp.float32)
    w1 = w1.at[:STATE_DIM, :HIDDEN].set(params["fc1_w"])

    w2 = jnp.zeros((HIDDEN_PAD, HIDDEN_PAD), jnp.float32)
    w2 = w2.at[:HIDDEN, :HIDDEN].set(params["fc2_w"])

    # fc3a | fc3b side by side: output lanes [0:64] actor, [64:128] critic
    w3 = jnp.zeros((HIDDEN_PAD, HIDDEN_PAD), jnp.float32)
    w3 = w3.at[:HIDDEN, :HIDDEN].set(params["fc3a_w"])
    w3 = w3.at[:HIDDEN, HIDDEN:2 * HIDDEN].set(params["fc3b_w"])

    # block-diagonal head: rows [0:64] x cols [0:43] = fc4a, rows [64:128] x col VALUE_LANE = fc4b
    w4 = jnp.zeros((HIDDEN_PAD, HEAD_PAD), jnp.float32)
    w4 = w4.at[:HIDDEN, :N_ACTIONS].set(params["fc4a_w"])
    w4 = w4.at[HIDDEN:2 * HIDDEN, VALUE_LANE:VALUE_LANE + 1].set(params["fc4b_w"])

    b = jnp.zeros((4, HEAD_PAD), jnp.float32)
    b = b.at[0, :HIDDEN].set(params["fc1_b"][0])
    b = b.at[1, :HIDDEN].set(params["fc2_b"][0])
    b = b.at[2, :HIDDEN].set(params["fc3a_b"][0])
    b = b.at[2, HIDDEN:2 * HIDDEN].set(params["fc3b_b"][0])
    b = b.at[3, :N_ACTIONS].set(params["fc4a_b"][0])
    b = b.at[3, VALUE_LANE].set(params["fc4b_b"][0, 0])

    return {"w1": w1, "w2": w2, "w3": w3, "w4": w4, "b": b}


def actor_critic_forward(state_vector, allowed_actions, packed):
    B = state_vector.shape[0]

    # Batch tile: multiple of 8 sublanes, capped at MAX_TILE_B; pad batch to a tile multiple.
    tile_b = min(MAX_TILE_B, ((B + 7) // 8) * 8)
    padded_b = pl.cdiv(B, tile_b) * tile_b

    x = jnp.zeros((padded_b, STATE_DIM_PAD), jnp.float32)
    x = x.at[:B, :STATE_DIM].set(state_vector)
    mask = jnp.zeros((padded_b, HEAD_PAD), jnp.float32)
    mask = mask.at[:B, :N_ACTIONS].set(allowed_actions)

    def w_spec(shape):
        return pl.BlockSpec(shape, lambda i: (0, 0))   # weights VMEM-resident across grid steps

    out = pl.pallas_call(
        _actor_critic_kernel,
        out_shape=jax.ShapeDtypeStruct((padded_b, HEAD_PAD), jnp.float32),
        grid=(padded_b // tile_b,),
        in_specs=[
            pl.BlockSpec((tile_b, STATE_DIM_PAD), lambda i: (i, 0)),
            pl.BlockSpec((tile_b, HEAD_PAD), lambda i: (i, 0)),
            w_spec((STATE_DIM_PAD, HIDDEN_PAD)),
            w_spec((HIDDEN_PAD, HIDDEN_PAD)),
            w_spec((HIDDEN_PAD, HIDDEN_PAD)),
            w_spec((HIDDEN_PAD, HEAD_PAD)),
            w_spec((4, HEAD_PAD)),
        ],
        out_specs=pl.BlockSpec((tile_b, HEAD_PAD), lambda i: (i, 0)),
        compiler_params=pltpu.CompilerParams(
            dimension_semantics=("parallel",),   # shards batch across both TCs on v7x
        ),
    )(x, mask, packed["w1"], packed["w2"], packed["w3"], packed["w4"], packed["b"])

    probs = out[:B, :N_ACTIONS]
    value = out[:B, VALUE_LANE:VALUE_LANE + 1]
    return probs, value


def reference_forward(state_vector, allowed_actions, params):
    """Pure-JAX reference replicating the PyTorch forward exactly (unfused params)."""
    def lin(x, name):
        return x @ params[name + "_w"] + params[name + "_b"]
    x = jax.nn.relu(lin(state_vector, "fc1"))
    x = jax.nn.relu(lin(x, "fc2"))
    ax = jax.nn.relu(lin(x, "fc3a"))
    bx = jax.nn.relu(lin(x, "fc3b"))
    ax = lin(ax, "fc4a")
    bx = lin(bx, "fc4b")
    ax = jnp.where(allowed_actions == 0.0, NEG_INF, ax)
    ax = jax.nn.softmax(ax, axis=-1)
    return ax, bx


if __name__ == "__main__":
    key = jax.random.PRNGKey(0)
    kp, kx, km = jax.random.split(key, 3)

    params = init_params(kp)
    packed = pack_params(params)

    B = 8
    state_vector = jax.random.normal(kx, (B, STATE_DIM), jnp.float32)
    # Random binary allowed-action mask; guarantee at least one allowed action per row.
    allowed = (jax.random.uniform(km, (B, N_ACTIONS)) > 0.5).astype(jnp.float32)
    allowed = allowed.at[:, 0].set(1.0)

    probs, value = actor_critic_forward(state_vector, allowed, packed)
    probs = jax.block_until_ready(probs)
    value = jax.block_until_ready(value)

    ref_probs, ref_value = reference_forward(state_vector, allowed, params)

    assert probs.shape == (B, N_ACTIONS) and value.shape == (B, 1)
    assert jnp.allclose(probs, ref_probs, atol=1e-5, rtol=1e-5)
    assert jnp.allclose(value, ref_value, atol=1e-5, rtol=1e-5)
    assert jnp.allclose(jnp.sum(probs, axis=-1), 1.0, atol=1e-5)
    # masked (disallowed) actions must have exactly zero probability
    assert jnp.all(jnp.where(allowed == 0.0, probs, 0.0) == 0.0)

    print("KERNEL_OK")
</pallas_src>

<mosaic_0001>
module attributes {stable_mosaic.version = 11 : i64} {
  func.func @_actor_critic_kernel(%arg0: i32, %arg1: memref<8x384xf32, #tpu.memory_space<vmem>>, %arg2: memref<8x128xf32, #tpu.memory_space<vmem>>, %arg3: memref<384x128xf32, #tpu.memory_space<vmem>>, %arg4: memref<128x128xf32, #tpu.memory_space<vmem>>, %arg5: memref<128x128xf32, #tpu.memory_space<vmem>>, %arg6: memref<128x128xf32, #tpu.memory_space<vmem>>, %arg7: memref<4x128xf32, #tpu.memory_space<vmem>>, %arg8: memref<8x128xf32, #tpu.memory_space<vmem>>) attributes {dimension_semantics = [#tpu.dimension_semantics<parallel>], iteration_bounds = array<i64: 1>, scalar_prefetch = 0 : i64, scratch_operands = 0 : i64, tpu.core_type = #tpu.core_type<tc>, window_params = [{transform_indices = @transform_0, window_bounds = array<i64: 8, 384>}, {transform_indices = @transform_1, window_bounds = array<i64: 8, 128>}, {pipeline_mode = #tpu.pipeline_mode<synchronous>, transform_indices = @transform_2, window_bounds = array<i64: 384, 128>}, {pipeline_mode = #tpu.pipeline_mode<synchronous>, transform_indices = @transform_3, window_bounds = array<i64: 128, 128>}, {pipeline_mode = #tpu.pipeline_mode<synchronous>, transform_indices = @transform_4, window_bounds = array<i64: 128, 128>}, {pipeline_mode = #tpu.pipeline_mode<synchronous>, transform_indices = @transform_5, window_bounds = array<i64: 128, 128>}, {pipeline_mode = #tpu.pipeline_mode<synchronous>, transform_indices = @transform_6, window_bounds = array<i64: 4, 128>}, {transform_indices = @transform_7, window_bounds = array<i64: 8, 128>}]} {
    %c0 = arith.constant 0 : index
    %c0_0 = arith.constant 0 : index
    %0 = vector.load %arg1[%c0, %c0_0] : memref<8x384xf32, #tpu.memory_space<vmem>>, vector<8x384xf32>
    %c0_1 = arith.constant 0 : index
    %c0_2 = arith.constant 0 : index
    %1 = vector.load %arg2[%c0_1, %c0_2] : memref<8x128xf32, #tpu.memory_space<vmem>>, vector<8x128xf32>
    %c0_3 = arith.constant 0 : index
    %c0_4 = arith.constant 0 : index
    %2 = vector.load %arg7[%c0_3, %c0_4] : memref<4x128xf32, #tpu.memory_space<vmem>>, vector<1x128xf32>
    %c1 = arith.constant 1 : index
    %c0_5 = arith.constant 0 : index
    %3 = vector.load %arg7[%c1, %c0_5] : memref<4x128xf32, #tpu.memory_space<vmem>>, vector<1x128xf32>
    %c2 = arith.constant 2 : index
    %c0_6 = arith.constant 0 : index
    %4 = vector.load %arg7[%c2, %c0_6] : memref<4x128xf32, #tpu.memory_space<vmem>>, vector<1x128xf32>
    %c3 = arith.constant 3 : index
    %c0_7 = arith.constant 0 : index
    %5 = vector.load %arg7[%c3, %c0_7] : memref<4x128xf32, #tpu.memory_space<vmem>>, vector<1x128xf32>
    %c0_8 = arith.constant 0 : index
    %c0_9 = arith.constant 0 : index
    %6 = vector.load %arg3[%c0_8, %c0_9] : memref<384x128xf32, #tpu.memory_space<vmem>>, vector<384x128xf32>
    %cst = arith.constant dense<0.000000e+00> : vector<8x128xf32>
    %7 = tpu.matmul %0, %6, %cst {dimension_numbers = #tpu.dot_dimension_numbers<[1], [0], [0], [1], [0, 0, 1, 1], [], []>} : vector<8x384xf32>, vector<384x128xf32>, vector<8x128xf32> -> vector<8x128xf32>
    %8 = vector.broadcast %2 : vector<1x128xf32> to vector<8x128xf32>
    %9 = arith.addf %7, %8 : vector<8x128xf32>
    %cst_10 = arith.constant 0.000000e+00 : f32
    %10 = vector.broadcast %cst_10 : f32 to vector<8x128xf32>
    %11 = arith.maximumf %9, %10 : vector<8x128xf32>
    %c0_11 = arith.constant 0 : index
    %c0_12 = arith.constant 0 : index
    %12 = vector.load %arg4[%c0_11, %c0_12] : memref<128x128xf32, #tpu.memory_space<vmem>>, vector<128x128xf32>
    %cst_13 = arith.constant dense<0.000000e+00> : vector<8x128xf32>
    %13 = tpu.matmul %11, %12, %cst_13 {dimension_numbers = #tpu.dot_dimension_numbers<[1], [0], [0], [1], [0, 0, 1, 1], [], []>} : vector<8x128xf32>, vector<128x128xf32>, vector<8x128xf32> -> vector<8x128xf32>
    %14 = vector.broadcast %3 : vector<1x128xf32> to vector<8x128xf32>
    %15 = arith.addf %13, %14 : vector<8x128xf32>
    %cst_14 = arith.constant 0.000000e+00 : f32
    %16 = vector.broadcast %cst_14 : f32 to vector<8x128xf32>
    %17 = arith.maximumf %15, %16 : vector<8x128xf32>
    %c0_15 = arith.constant 0 : index
    %c0_16 = arith.constant 0 : index
    %18 = vector.load %arg5[%c0_15, %c0_16] : memref<128x128xf32, #tpu.memory_space<vmem>>, vector<128x128xf32>
    %cst_17 = arith.constant dense<0.000000e+00> : vector<8x128xf32>
    %19 = tpu.matmul %17, %18, %cst_17 {dimension_numbers = #tpu.dot_dimension_numbers<[1], [0], [0], [1], [0, 0, 1, 1], [], []>} : vector<8x128xf32>, vector<128x128xf32>, vector<8x128xf32> -> vector<8x128xf32>
    %20 = vector.broadcast %4 : vector<1x128xf32> to vector<8x128xf32>
    %21 = arith.addf %19, %20 : vector<8x128xf32>
    %cst_18 = arith.constant 0.000000e+00 : f32
    %22 = vector.broadcast %cst_18 : f32 to vector<8x128xf32>
    %23 = arith.maximumf %21, %22 : vector<8x128xf32>
    %c0_19 = arith.constant 0 : index
    %c0_20 = arith.constant 0 : index
    %24 = vector.load %arg6[%c0_19, %c0_20] : memref<128x128xf32, #tpu.memory_space<vmem>>, vector<128x128xf32>
    %cst_21 = arith.constant dense<0.000000e+00> : vector<8x128xf32>
    %25 = tpu.matmul %23, %24, %cst_21 {dimension_numbers = #tpu.dot_dimension_numbers<[1], [0], [0], [1], [0, 0, 1, 1], [], []>} : vector<8x128xf32>, vector<128x128xf32>, vector<8x128xf32> -> vector<8x128xf32>
    %26 = vector.broadcast %5 : vector<1x128xf32> to vector<8x128xf32>
    %27 = arith.addf %25, %26 : vector<8x128xf32>
    %cst_22 = arith.constant 0.000000e+00 : f32
    %28 = vector.broadcast %cst_22 : f32 to vector<8x128xf32>
    %29 = arith.cmpf oeq, %1, %28 : vector<8x128xf32>
    %cst_23 = arith.constant -1.000000e+09 : f32
    %30 = vector.broadcast %cst_23 : f32 to vector<8x128xf32>
    %31 = arith.select %29, %30, %27 : vector<8x128xi1>, vector<8x128xf32>
    %cst_24 = arith.constant dense<0xFF800000> : vector<8xf32>
    %32 = vector.multi_reduction <maximumf>, %31, %cst_24 [1] : vector<8x128xf32> to vector<8xf32>
    %33 = vector.shape_cast %32 : vector<8xf32> to vector<8x1xf32>
    %34 = vector.broadcast %33 : vector<8x1xf32> to vector<8x128xf32>
    %35 = arith.subf %31, %34 : vector<8x128xf32>
    %36 = math.exp %35 : vector<8x128xf32>
    %cst_25 = arith.constant dense<0.000000e+00> : vector<8xf32>
    %37 = vector.multi_reduction <add>, %36, %cst_25 [1] : vector<8x128xf32> to vector<8xf32>
    %38 = vector.shape_cast %37 : vector<8xf32> to vector<8x1xf32>
    %39 = tpu.reciprocal %38 : vector<8x1xf32> -> vector<8x1xf32>
    %40 = vector.broadcast %39 : vector<8x1xf32> to vector<8x128xf32>
    %41 = arith.mulf %36, %40 : vector<8x128xf32>
    %42 = tpu.iota {dimensions = array<i32: 1>} : vector<8x128xi32>
    %c64_i32 = arith.constant 64 : i32
    %43 = vector.broadcast %c64_i32 : i32 to vector<8x128xi32>
    %44 = arith.cmpi eq, %42, %43 : vector<8x128xi32>
    %45 = arith.select %44, %27, %41 : vector<8x128xi1>, vector<8x128xf32>
    %c0_26 = arith.constant 0 : index
    %c0_27 = arith.constant 0 : index
    %46 = vector.load %arg8[%c0_26, %c0_27] : memref<8x128xf32, #tpu.memory_space<vmem>>, vector<8x128xf32>
    tpu.vector_store %arg8[%c0_26, %c0_27], %45 {strides = array<i32>} : memref<8x128xf32, #tpu.memory_space<vmem>>, vector<8x128xf32>,
    return
  }
  func.func @transform_0(%arg0: i32) -> (i32, i32) {
    %c0_i32 = arith.constant 0 : i32
    %c0_i32_0 = arith.constant 0 : i32
    return %arg0, %c0_i32 : i32, i32
  }
  func.func @transform_1(%arg0: i32) -> (i32, i32) {
    %c0_i32 = arith.constant 0 : i32
    %c0_i32_0 = arith.constant 0 : i32
    return %arg0, %c0_i32 : i32, i32
  }
  func.func @transform_2(%arg0: i32) -> (i32, i32) {
    %c0_i32 = arith.constant 0 : i32
    %c0_i32_0 = arith.constant 0 : i32
    %c0_i32_1 = arith.constant 0 : i32
    return %c0_i32, %c0_i32_0 : i32, i32
  }
  func.func @transform_3(%arg0: i32) -> (i32, i32) {
    %c0_i32 = arith.constant 0 : i32
    %c0_i32_0 = arith.constant 0 : i32
    %c0_i32_1 = arith.constant 0 : i32
    return %c0_i32, %c0_i32_0 : i32, i32
  }
  func.func @transform_4(%arg0: i32) -> (i32, i32) {
    %c0_i32 = arith.constant 0 : i32
    %c0_i32_0 = arith.constant 0 : i32
    %c0_i32_1 = arith.constant 0 : i32
    return %c0_i32, %c0_i32_0 : i32, i32
  }
  func.func @transform_5(%arg0: i32) -> (i32, i32) {
    %c0_i32 = arith.constant 0 : i32
    %c0_i32_0 = arith.constant 0 : i32
    %c0_i32_1 = arith.constant 0 : i32
    return %c0_i32, %c0_i32_0 : i32, i32
  }
  func.func @transform_6(%arg0: i32) -> (i32, i32) {
    %c0_i32 = arith.constant 0 : i32
    %c0_i32_0 = arith.constant 0 : i32
    %c0_i32_1 = arith.constant 0 : i32
    return %c0_i32, %c0_i32_0 : i32, i32
  }
  func.func @transform_7(%arg0: i32) -> (i32, i32) {
    %c0_i32 = arith.constant 0 : i32
    %c0_i32_0 = arith.constant 0 : i32
    return %arg0, %c0_i32 : i32, i32
  }
}

</mosaic_0001>

<bundles_post_ra>
// kernel: tpu_custom_call.1
= control target key start
LH: loop header
LB: loop body
LE: loop exit
PB: predicated region body
PF: predicated region fallthrough
CT: control target
= control target key end

     0   :  { %12 = vsyncpa [#allocation3], 0  ;;  %s1367_s0 = inlined_call_operand.hbm [shape: f32[8,384], index: 0, kind: input, shape index: {}]   ;;  %s1368_s1 = inlined_call_operand.hbm [shape: f32[8,128], index: 1, kind: input, shape index: {}]   ;;  %s1369_s2 = inlined_call_operand.hbm [shape: f32[384,128], index: 2, kind: input, shape index: {}]   ;;  %s1370_s3 = inlined_call_operand.hbm [shape: f32[128,128], index: 3, kind: input, shape index: {}]   ;;  %s1371_s4 = inlined_call_operand.hbm [shape: f32[128,128], index: 4, kind: input, shape index: {}]   ;;  %s1372_s5 = inlined_call_operand.hbm [shape: f32[128,128], index: 5, kind: input, shape index: {}]   ;;  %s1373_s6 = inlined_call_operand.vmem [shape: f32[4,128], index: 6, kind: input, shape index: {}]   ;;  %s1374_s7 = inlined_call_operand.hbm [shape: f32[8,128], index: 7, kind: output, shape index: {}]  }
   0x1   :  { %13 = vsyncpa [#allocation6], 0 }
   0x2   :  { %14 = vsyncpa [#allocation9], 0 }
   0x3   :  { %15 = vsyncpa [#allocation12], 0 }
   0x4   :  { %16 = vsyncpa [#allocation4], 0  ;;  %s1167_s24 = smov [#allocation5]   ;;  %s1003_s28 = scalar_lea.hbm %s1368_s1, 128 }
   0x5   :  { %s33_s25 = sshll.u32 %s1167_s24, 4  ;;  %p1004_p0 = scmp.ne.s32.totalorder %s1368_s1, %s1003_s28  ;;  %s34_s25 = int_to_ptr.vmem [resolvable:$true] %s33_s25 }
   0x6   :  { %p1007_p1 = scmp.lt.u32.totalorder %s1003_s28, %s1368_s1 }
   0x8   :  { %p1009_p2 = pnand %p1007_p1, %p1004_p0 }
   0xa   :  { %1012 = shalt.err (!%p1009_p2)
}
   0xb   :  { %s1013_s10 = scalar_lea.vmem %s34_s25, 128  ;;  %p1018_p4 = scmp.lt.s32.totalorder %s34_s25, %s34_s25 }
   0xc   :  { %p1014_p3 = scmp.ne.s32.totalorder %s34_s25, %s1013_s10  ;;  %p1019_p5 = scmp.lt.s32.totalorder %s1013_s10, %s1013_s10 }
   0xe   :  { %p1020_p6 = por %p1019_p5, %p1018_p4 }
  0x10   :  { %p1021_p7 = pnand %p1020_p6, %p1014_p3 }
  0x12   :  { %1024 = shalt.err (!%p1021_p7)
}
  0x13   :  { %36 = dma.hbm_to_vmem [thread:$0]  %s1368_s1, 128, %s34_s25, [#allocation6]  }
  0x14   :  { %s1168_s13 = smov [#allocation8]   ;;  %s1169_s15 = smov [#allocation2]  }
  0x15   :  { %s54_s14 = sshll.u32 %s1168_s13, 4  ;;  %s23_s16 = sshll.u32 %s1169_s15, 4  ;;  %s55_s14 = int_to_ptr.vmem [resolvable:$true] %s54_s14  ;;  %s24_s16 = int_to_ptr.vmem [resolvable:$true] %s23_s16 }
  0x16   :  { %s1025_s19 = scalar_lea.hbm %s1370_s3, 2048 }
  0x17   :  { %p1026_p8 = scmp.ne.s32.totalorder %s1370_s3, %s1025_s19  ;;  %p1029_p9 = scmp.lt.u32.totalorder %s1025_s19, %s1370_s3 }
  0x19   :  { %p1031_p10 = pnand %p1029_p9, %p1026_p8 }
  0x1b   :  { %1034 = shalt.err (!%p1031_p10)
}
  0x1c   :  { %s1035_s1 = scalar_lea.vmem %s55_s14, 2048  ;;  %p1040_p12 = scmp.lt.s32.totalorder %s55_s14, %s55_s14 }
  0x1d   :  { %p1036_p11 = scmp.ne.s32.totalorder %s55_s14, %s1035_s1  ;;  %p1041_p13 = scmp.lt.s32.totalorder %s1035_s1, %s1035_s1 }
  0x1f   :  { %p1042_p0 = por %p1041_p13, %p1040_p12 }
  0x21   :  { %p1043_p1 = pnand %p1042_p0, %p1036_p11 }
  0x23   :  { %1046 = shalt.err (!%p1043_p1)
}
  0x24   :  { %s1170_s24 = smov 128   ;;  %s1171_s25 = smov 8  }
  0x25   :  { %60 = dma.hbm_to_vmem [thread:$0]  %s1370_s3, 2048, %s55_s14, [#allocation9], %s1170_s24, %s1170_s24, %s1171_s25  }
  0x26   :  { %s1047_s30 = scalar_lea.hbm %s1367_s0, 384 }
  0x27   :  { %p1048_p2 = scmp.ne.s32.totalorder %s1367_s0, %s1047_s30  ;;  %p1051_p3 = scmp.lt.u32.totalorder %s1047_s30, %s1367_s0 }
  0x29   :  { %p1053_p4 = pnand %p1051_p3, %p1048_p2 }
  0x2b   :  { %1056 = shalt.err (!%p1053_p4)
}
  0x2c   :  { %s1057_s12 = scalar_lea.vmem %s24_s16, 384  ;;  %p1062_p6 = scmp.lt.s32.totalorder %s24_s16, %s24_s16 }
  0x2d   :  { %p1058_p5 = scmp.ne.s32.totalorder %s24_s16, %s1057_s12  ;;  %p1063_p7 = scmp.lt.s32.totalorder %s1057_s12, %s1057_s12 }
  0x2f   :  { %p1064_p8 = por %p1063_p7, %p1062_p6 }
  0x31   :  { %p1065_p9 = pnand %p1064_p8, %p1058_p5 }
  0x33   :  { %1068 = shalt.err (!%p1065_p9)
}
  0x34   :  { %26 = dma.hbm_to_vmem [thread:$0]  %s1367_s0, 384, %s24_s16, [#allocation3]  }
  0x35   :  { %s1172_s14 = smov [#allocation7]   ;;  %s1173_s17 = smov [#allocation10]  }
  0x36   :  { %s42_s15 = sshll.u32 %s1172_s14, 4  ;;  %s66_s18 = sshll.u32 %s1173_s17, 4  ;;  %s43_s15 = int_to_ptr.vmem [resolvable:$true] %s42_s15  ;;  %s67_s18 = int_to_ptr.vmem [resolvable:$true] %s66_s18 }
  0x37   :  { %s1069_s21 = scalar_lea.hbm %s1369_s2, 6144 }
  0x38   :  { %p1070_p10 = scmp.ne.s32.totalorder %s1369_s2, %s1069_s21  ;;  %p1073_p11 = scmp.lt.u32.totalorder %s1069_s21, %s1369_s2 }
  0x3a   :  { %p1075_p12 = pnand %p1073_p11, %p1070_p10 }
  0x3c   :  { %1078 = shalt.err (!%p1075_p12)
}
  0x3d   :  { %s1079_s0 = scalar_lea.vmem %s43_s15, 6144  ;;  %p1084_p0 = scmp.lt.s32.totalorder %s43_s15, %s43_s15 }
  0x3e   :  { %p1080_p13 = scmp.ne.s32.totalorder %s43_s15, %s1079_s0  ;;  %p1085_p1 = scmp.lt.s32.totalorder %s1079_s0, %s1079_s0 }
  0x40   :  { %p1086_p2 = por %p1085_p1, %p1084_p0 }
  0x42   :  { %p1087_p3 = pnand %p1086_p2, %p1080_p13 }
  0x44   :  { %1090 = shalt.err (!%p1087_p3)
}
  0x45   :  { %48 = dma.hbm_to_vmem [thread:$0]  %s1369_s2, 6144, %s43_s15, [#allocation6], %s1170_s24, %s1170_s24, %s1171_s25  }
  0x46   :  { %s1091_s30 = scalar_lea.hbm %s1371_s4, 2048 }
  0x47   :  { %p1092_p4 = scmp.ne.s32.totalorder %s1371_s4, %s1091_s30  ;;  %p1095_p5 = scmp.lt.u32.totalorder %s1091_s30, %s1371_s4 }
  0x49   :  { %p1097_p6 = pnand %p1095_p5, %p1092_p4 }
  0x4b   :  { %1100 = shalt.err (!%p1097_p6)
}
  0x4c   :  { %s1101_s12 = scalar_lea.vmem %s67_s18, 2048  ;;  %p1106_p8 = scmp.lt.s32.totalorder %s67_s18, %s67_s18 }
  0x4d   :  { %p1102_p7 = scmp.ne.s32.totalorder %s67_s18, %s1101_s12  ;;  %p1107_p9 = scmp.lt.s32.totalorder %s1101_s12, %s1101_s12 }
  0x4f   :  { %p1108_p10 = por %p1107_p9, %p1106_p8 }
  0x51   :  { %p1109_p11 = pnand %p1108_p10, %p1102_p7 }
  0x53   :  { %1112 = shalt.err (!%p1109_p11)
}
  0x54   :  { %72 = dma.hbm_to_vmem [thread:$0]  %s1371_s4, 2048, %s67_s18, [#allocation9], %s1170_s24, %s1170_s24, %s1171_s25  }
  0x55   :  { %s1174_s13 = smov [#allocation11]   ;;  %s1113_s19 = scalar_lea.hbm %s1372_s5, 2048 }
  0x56   :  { %s78_s14 = sshll.u32 %s1174_s13, 4  ;;  %p1114_p12 = scmp.ne.s32.totalorder %s1372_s5, %s1113_s19  ;;  %s79_s14 = int_to_ptr.vmem [resolvable:$true] %s78_s14 }
  0x57   :  { %p1117_p13 = scmp.lt.u32.totalorder %s1113_s19, %s1372_s5 }
  0x59   :  { %p1119_p0 = pnand %p1117_p13, %p1114_p12 }
  0x5b   :  { %1122 = shalt.err (!%p1119_p0)
}
  0x5c   :  { %s1123_s1 = scalar_lea.vmem %s79_s14, 2048  ;;  %p1128_p2 = scmp.lt.s32.totalorder %s79_s14, %s79_s14 }
  0x5d   :  { %p1124_p1 = scmp.ne.s32.totalorder %s79_s14, %s1123_s1  ;;  %p1129_p3 = scmp.lt.s32.totalorder %s1123_s1, %s1123_s1 }
  0x5f   :  { %p1130_p4 = por %p1129_p3, %p1128_p2 }
  0x61   :  { %p1131_p5 = pnand %p1130_p4, %p1124_p1 }
  0x63   :  { %1134 = shalt.err (!%p1131_p5)
}
  0x64   :  { %84 = dma.hbm_to_vmem [thread:$0]  %s1372_s5, 2048, %s79_s14, [#allocation12], %s1170_s24, %s1170_s24, %s1171_s25  }
  0x65   :  { %1157 = dma.done.wait [#allocation3], 384  }
  0x66   :  { %1158 = vsyncadd [#allocation3], 4294966912 }
  0x67   :  { %1159 = dma.done.wait [#allocation6], 6272  }
  0x68   :  { %1160 = vsyncadd [#allocation6], 4294961024 }
  0x69   :  { %1161 = dma.done.wait [#allocation9], 4096  }
  0x6a   :  { %1162 = vsyncadd [#allocation9], 4294963200 }
  0x6b   :  { %1163 = dma.done.wait [#allocation12], 2048  }
  0x6c   :  { %1164 = vsyncadd [#allocation12], 4294965248  ;;  %v1175_v0 = vmov 0.0|0.0   ;;  %vm1176_vm0 = vmmov 0   ;;  %v1177_v1 = vmov 0.0   ;;  %v129_v2 = vld [vmem:[#allocation7 + $0x80] sm:$0xff] }
  0x6d   :  { %891 = vmatprep.subr.bf16.mxu1 %v1175_v0  ;;  %751 = vmatprep.mubr.msk.f32.mxu1 %vm1176_vm0, %v1177_v1  ;;  %v130_v3 = vld [vmem:[#allocation7 + $0x88] sm:$0xff]  ;;  %v113_v4 = vld [vmem:[#allocation7] sm:$0xff]  ;;  %v131_v7 = vld [vmem:[#allocation7 + $0x90] sm:$0xff]  ;;  %s1178_s29 = smov [#allocation13]  }
  0x6e   :  { %v859_v5 = vpack.c.bf16 %v130_v3, %v129_v2  ;;  %v114_v6 = vld [vmem:[#allocation7 + $0x8] sm:$0xff]  ;;  %v132_v8 = vld [vmem:[#allocation7 + $0x98] sm:$0xff]  ;;  %v115_v11 = vld [vmem:[#allocation7 + $0x10] sm:$0xff]  ;;  %s600_s30 = sshll.u32 %s1178_s29, 4  ;;  %s601_s30 = int_to_ptr.vmem [resolvable:$true] %s600_s30 }
  0x6f   :  { %v861_v9 = vpack.c.bf16 %v114_v6, %v113_v4  ;;  %v863_v10 = vpack.c.bf16 %v132_v8, %v131_v7  ;;  %v116_v12 = vld [vmem:[#allocation7 + $0x18] sm:$0xff]  ;;  %v145_v13 = vld [vmem:[#allocation7 + $0x100] sm:$0xff]  ;;  %v146_v14 = vld [vmem:[#allocation7 + $0x108] sm:$0xff]  ;;  %p1140_p7 = scmp.lt.s32.totalorder %s601_s30, %s601_s30 }
  0x70   :  { %860 = vmatprep.subr.bf16.mxu0 %v859_v5  ;;  %v133_v15 = vld [vmem:[#allocation7 + $0xa0] sm:$0xff]  ;;  %v134_v16 = vld [vmem:[#allocation7 + $0xa8] sm:$0xff]  ;;  %v865_v17 = vpack.c.bf16 %v116_v12, %v115_v11  ;;  %v892_v18 = vpack.c.bf16 %v146_v14, %v145_v13  ;;  %v147_v19 = vld [vmem:[#allocation7 + $0x110] sm:$0xff] }
  0x71   :  { %862 = vmatpush3.bf16.msra.mxu0 %v861_v9  ;;  %v867_v20 = vpack.c.bf16 %v134_v16, %v133_v15  ;;  %v117_v21 = vld [vmem:[#allocation7 + $0x20] sm:$0xff]  ;;  %v118_v22 = vld [vmem:[#allocation7 + $0x28] sm:$0xff]  ;;  %v148_v23 = vld [vmem:[#allocation7 + $0x118] sm:$0xff] }
  0x72   :  { %864 = vmatprep.subr.bf16.mxu0 %v863_v10  ;;  %893 = vmatpush3.bf16.msra.mxu1 %v892_v18  ;;  %v895_v24 = vpack.c.bf16 %v148_v23, %v147_v19  ;;  %v135_v25 = vld [vmem:[#allocation7 + $0xb0] sm:$0xff]  ;;  %v136_v26 = vld [vmem:[#allocation7 + $0xb8] sm:$0xff]  ;;  %v149_v27 = vld [vmem:[#allocation7 + $0x120] sm:$0xff]  ;;  %v869_v29 = vpack.c.bf16 %v118_v22, %v117_v21 }
  0x73   :  { %894 = vmatprep.subr.bf16.mxu1 %v1175_v0  ;;  %v150_v28 = vld [vmem:[#allocation7 + $0x128] sm:$0xff]  ;;  %v871_v30 = vpack.c.bf16 %v136_v26, %v135_v25  ;;  %v119_v31 = vld [vmem:[#allocation7 + $0x30] sm:$0xff]  ;;  %v120_v32 = vld [vmem:[#allocation7 + $0x38] sm:$0xff] }
  0x74   :  { %v898_v33 = vpack.c.bf16 %v150_v28, %v149_v27  ;;  %v137_v34 = vld [vmem:[#allocation7 + $0xc0] sm:$0xff]  ;;  %v138_v35 = vld [vmem:[#allocation7 + $0xc8] sm:$0xff]  ;;  %v151_v36 = vld [vmem:[#allocation7 + $0x130] sm:$0xff]  ;;  %v873_v38 = vpack.c.bf16 %v120_v32, %v119_v31 }
  0x75   :  { %866 = vmatpush3.bf16.msra.mxu0 %v865_v17  ;;  %v152_v37 = vld [vmem:[#allocation7 + $0x138] sm:$0xff]  ;;  %v875_v39 = vpack.c.bf16 %v138_v35, %v137_v34  ;;  %v121_v40 = vld [vmem:[#allocation7 + $0x40] sm:$0xff]  ;;  %v122_v41 = vld [vmem:[#allocation7 + $0x48] sm:$0xff] }
  0x76   :  { %868 = vmatprep.subr.bf16.mxu0 %v867_v20  ;;  %896 = vmatpush3.bf16.msra.mxu1 %v895_v24  ;;  %v901_v42 = vpack.c.bf16 %v152_v37, %v151_v36  ;;  %v139_v43 = vld [vmem:[#allocation7 + $0xd0] sm:$0xff]  ;;  %v140_v44 = vld [vmem:[#allocation7 + $0xd8] sm:$0xff]  ;;  %v153_v45 = vld [vmem:[#allocation7 + $0x140] sm:$0xff]  ;;  %v877_v48 = vpack.c.bf16 %v122_v41, %v121_v40 }
  0x77   :  { %897 = vmatprep.subr.bf16.mxu1 %v1175_v0  ;;  %v154_v46 = vld [vmem:[#allocation7 + $0x148] sm:$0xff]  ;;  %v879_v49 = vpack.c.bf16 %v140_v44, %v139_v43  ;;  %v123_v50 = vld [vmem:[#allocation7 + $0x50] sm:$0xff]  ;;  %v124_v51 = vld [vmem:[#allocation7 + $0x58] sm:$0xff] }
  0x78   :  { %v106_v47 = vld [vmem:[#allocation2 + $0x8] sm:$0xff]  ;;  %v904_v52 = vpack.c.bf16 %v154_v46, %v153_v45  ;;  %v141_v53 = vld [vmem:[#allocation7 + $0xe0] sm:$0xff]  ;;  %v155_v55 = vld [vmem:[#allocation7 + $0x150] sm:$0xff]  ;;  %v881_v57 = vpack.c.bf16 %v124_v51, %v123_v50 }
  0x79   :  { %870 = vmatpush3.bf16.msra.mxu0 %v869_v29  ;;  %229 = vmatprep.mubr.f32.mxu0 %v106_v47  ;;  %v142_v54 = vld [vmem:[#allocation7 + $0xe8] sm:$0xff]  ;;  %v156_v56 = vld [vmem:[#allocation7 + $0x158] sm:$0xff]  ;;  %v125_v59 = vld [vmem:[#allocation7 + $0x60] sm:$0xff] }
  0x7a   :  { %872 = vmatprep.subr.bf16.mxu0 %v871_v30  ;;  %899 = vmatpush3.bf16.msra.mxu1 %v898_v33  ;;  %v883_v58 = vpack.c.bf16 %v142_v54, %v141_v53  ;;  %v126_v60 = vld [vmem:[#allocation7 + $0x68] sm:$0xff]  ;;  %v907_v61 = vpack.c.bf16 %v156_v56, %v155_v55  ;;  %v143_v62 = vld [vmem:[#allocation7 + $0xf0] sm:$0xff]  ;;  %v144_v63 = vld [vmem:[#allocation7 + $0xf8] sm:$0xff] }
  0x7b   :  { %900 = vmatprep.subr.bf16.mxu1 %v1175_v0  ;;  %v157_v2 = vld [vmem:[#allocation7 + $0x160] sm:$0xff]  ;;  %v158_v3 = vld [vmem:[#allocation7 + $0x168] sm:$0xff]  ;;  %v885_v4 = vpack.c.bf16 %v126_v60, %v125_v59  ;;  %v887_v5 = vpack.c.bf16 %v144_v63, %v143_v62  ;;  %v127_v6 = vld [vmem:[#allocation7 + $0x70] sm:$0xff] }
  0x7c   :  { %v128_v7 = vld [vmem:[#allocation7 + $0x78] sm:$0xff]  ;;  %v910_v8 = vpack.c.bf16 %v158_v3, %v157_v2  ;;  %v159_v9 = vld [vmem:[#allocation7 + $0x170] sm:$0xff]  ;;  %v306_v12 = vld [vmem:[#allocation8] sm:$0xff] }
  0x7d   :  { %874 = vmatpush3.bf16.msra.mxu0 %v873_v38  ;;  %v160_v10 = vld [vmem:[#allocation7 + $0x178] sm:$0xff]  ;;  %v889_v11 = vpack.c.bf16 %v128_v7, %v127_v6  ;;  %v307_v13 = vld [vmem:[#allocation8 + $0x8] sm:$0xff]  ;;  %v105_v15 = vld [vmem:[#allocation2] sm:$0xff] }
  0x7e   :  { %876 = vmatprep.subr.bf16.mxu0 %v875_v39  ;;  %902 = vmatpush3.bf16.msra.mxu1 %v901_v42  ;;  %v913_v14 = vpack.c.bf16 %v160_v10, %v159_v9  ;;  %v916_v16 = vpack.c.bf16 %v307_v13, %v306_v12  ;;  %v308_v17 = vld [vmem:[#allocation8 + $0x10] sm:$0xff]  ;;  %v309_v18 = vld [vmem:[#allocation8 + $0x18] sm:$0xff]  ;;  %v310_v21 = vld [vmem:[#allocation8 + $0x20] sm:$0xff] }
  0x7f   :  { %903 = vmatprep.subr.bf16.mxu1 %v1175_v0  ;;  %v107_v19 = vld [vmem:[#allocation2 + $0x10] sm:$0xff]  ;;  %v919_v20 = vpack.c.bf16 %v309_v18, %v308_v17  ;;  %v311_v22 = vld [vmem:[#allocation8 + $0x28] sm:$0xff]  ;;  %v313_v25 = vld [vmem:[#allocation8 + $0x38] sm:$0xff] }
  0x80   :  { %v922_v23 = vpack.c.bf16 %v311_v22, %v310_v21  ;;  %v312_v24 = vld [vmem:[#allocation8 + $0x30] sm:$0xff]  ;;  %v314_v27 = vld [vmem:[#allocation8 + $0x40] sm:$0xff]  ;;  %v315_v28 = vld [vmem:[#allocation8 + $0x48] sm:$0xff] }
  0x81   :  { %878 = vmatpush3.bf16.msra.mxu0 %v877_v48  ;;  %v925_v26 = vpack.c.bf16 %v313_v25, %v312_v24  ;;  %v928_v29 = vpack.c.bf16 %v315_v28, %v314_v27  ;;  %v316_v30 = vld [vmem:[#allocation8 + $0x50] sm:$0xff]  ;;  %v317_v31 = vld [vmem:[#allocation8 + $0x58] sm:$0xff]  ;;  %v318_v33 = vld [vmem:[#allocation8 + $0x60] sm:$0xff] }
  0x82   :  { %880 = vmatprep.subr.bf16.mxu0 %v879_v49  ;;  %905 = vmatpush3.bf16.msra.mxu1 %v904_v52  ;;  %v931_v32 = vpack.c.bf16 %v317_v31, %v316_v30  ;;  %v319_v34 = vld [vmem:[#allocation8 + $0x68] sm:$0xff]  ;;  %v320_v36 = vld [vmem:[#allocation8 + $0x70] sm:$0xff]  ;;  %v321_v37 = vld [vmem:[#allocation8 + $0x78] sm:$0xff] }
  0x83   :  { %906 = vmatprep.subr.bf16.mxu1 %v1175_v0  ;;  %v934_v35 = vpack.c.bf16 %v319_v34, %v318_v33  ;;  %v937_v38 = vpack.c.bf16 %v321_v37, %v320_v36  ;;  %v397_v39 = vld [vmem:[#allocation10] sm:$0xff]  ;;  %v398_v40 = vld [vmem:[#allocation10 + $0x8] sm:$0xff]  ;;  %v399_v41 = vld [vmem:[#allocation10 + $0x10] sm:$0xff] }
  0x84   :  { %v940_v42 = vpack.c.bf16 %v398_v40, %v397_v39  ;;  %v400_v43 = vld [vmem:[#allocation10 + $0x18] sm:$0xff]  ;;  %v401_v45 = vld [vmem:[#allocation10 + $0x20] sm:$0xff]  ;;  %v402_v46 = vld [vmem:[#allocation10 + $0x28] sm:$0xff] }
  0x85   :  { %882 = vmatpush3.bf16.msra.mxu0 %v881_v57  ;;  %v943_v44 = vpack.c.bf16 %v400_v43, %v399_v41  ;;  %v946_v47 = vpack.c.bf16 %v402_v46, %v401_v45  ;;  %v403_v48 = vld [vmem:[#allocation10 + $0x30] sm:$0xff]  ;;  %v404_v49 = vld [vmem:[#allocation10 + $0x38] sm:$0xff]  ;;  %v405_v51 = vld [vmem:[#allocation10 + $0x40] sm:$0xff] }
  0x86   :  { %884 = vmatprep.subr.bf16.mxu0 %v883_v58  ;;  %908 = vmatpush3.bf16.msra.mxu1 %v907_v61  ;;  %v949_v50 = vpack.c.bf16 %v404_v49, %v403_v48  ;;  %v406_v52 = vld [vmem:[#allocation10 + $0x48] sm:$0xff]  ;;  %v407_v54 = vld [vmem:[#allocation10 + $0x50] sm:$0xff]  ;;  %v408_v55 = vld [vmem:[#allocation10 + $0x58] sm:$0xff] }
  0x87   :  { %909 = vmatprep.subr.bf16.mxu1 %v1175_v0  ;;  %v952_v53 = vpack.c.bf16 %v406_v52, %v405_v51  ;;  %v955_v56 = vpack.c.bf16 %v408_v55, %v407_v54  ;;  %v409_v57 = vld [vmem:[#allocation10 + $0x60] sm:$0xff]  ;;  %v410_v58 = vld [vmem:[#allocation10 + $0x68] sm:$0xff]  ;;  %v411_v7 = vld [vmem:[#allocation10 + $0x70] sm:$0xff] }
  0x88   :  { %v958_v59 = vpack.c.bf16 %v410_v58, %v409_v57  ;;  %v612_v62 = vld [vmem:[%s1373_s6] ss:$0 sm:$0xff]  ;;  %v490_v12 = vld [vmem:[#allocation11 + $0x10] sm:$0xff]  ;;  %v493_v17 = vld [vmem:[#allocation11 + $0x28] sm:$0xff] }
  0x89   :  { %886 = vmatpush3.bf16.msra.mxu0 %v885_v4  ;;  %v488_v10 = vld [vmem:[#allocation11] sm:$0xff]  ;;  %v497_v22 = vld [vmem:[#allocation11 + $0x48] sm:$0xff]  ;;  %v498_v24 = vld [vmem:[#allocation11 + $0x50] sm:$0xff] }
  0x8a   :  { %888 = vmatprep.subr.bf16.mxu0 %v887_v5  ;;  %911 = vmatpush3.bf16.msra.mxu1 %v910_v8  ;;  %v412_v8 = vld [vmem:[#allocation10 + $0x78] sm:$0xff]  ;;  %v496_v21 = vld [vmem:[#allocation11 + $0x40] sm:$0xff]  ;;  %v501_v28 = vld [vmem:[#allocation11 + $0x68] sm:$0xff] }
  0x8b   :  { %912 = vmatprep.subr.bf16.mxu1 %v1175_v0  ;;  %v961_v9 = vpack.c.bf16 %v412_v8, %v411_v7  ;;  %v499_v25 = vld [vmem:[#allocation11 + $0x58] sm:$0xff]  ;;  %v500_v27 = vld [vmem:[#allocation11 + $0x60] sm:$0xff] }
  0x8c   :  { %v613_v30 = vld [vmem:[%s1373_s6 + $0x1] ss:$0 sm:$0xff]  ;;  %v503_v36 = vld [vmem:[#allocation11 + $0x78] sm:$0xff]  ;;  %v615_v43 = vld [vmem:[%s1373_s6 + $0x3] ss:$0 sm:$0xff] }
  0x8d   :  { %890 = vmatpush3.bf16.msra.mxu0 %v889_v11  ;;  %v489_v11 = vld [vmem:[#allocation11 + $0x8] sm:$0xff] }
  0x8e   :  { %915 = vmatprep.subr.bf16.mxu0 %v1175_v0  ;;  %914 = vmatpush3.bf16.msra.mxu1 %v913_v14  ;;  %v964_v13 = vpack.c.bf16 %v489_v11, %v488_v10  ;;  %v491_v14 = vld [vmem:[#allocation11 + $0x18] sm:$0xff] }
  0x8f   :  { %939 = vmatprep.subr.bf16.mxu1 %v1175_v0 }
  0x90   :  { %230 = vmatmul.mubr.f32.vlgmr.msra.gmra.mrb[0].mxu0 %v105_v15  ;;  %v967_v15 = vpack.c.bf16 %v491_v14, %v490_v12 }
  0x91   :  { %917 = vmatpush3.bf16.msra.mxu0 %v916_v16  ;;  %786 = vmatprep.mubr.msk.f32.mxu0 %vm1176_vm0, %v1177_v1  ;;  %v492_v16 = vld [vmem:[#allocation11 + $0x20] sm:$0xff] }
  0x92   :  { %752 = vmatmul.mubr.f32.vlgmr.msra.gmra.mrb[0].mxu1 %v107_v19  ;;  %918 = vmatprep.subr.bf16.mxu0 %v1175_v0  ;;  %v970_v18 = vpack.c.bf16 %v493_v17, %v492_v16  ;;  %v495_v19 = vld [vmem:[#allocation11 + $0x38] sm:$0xff] }
  0x93   :  { %821 = vmatprep.mubr.msk.f32.mxu1 %vm1176_vm0, %v1177_v1  ;;  %941 = vmatpush3.bf16.msra.mxu1 %v940_v42  ;;  %v108_v42 = vld [vmem:[#allocation5] sm:$0xff] }
  0x94   :  { %942 = vmatprep.subr.bf16.mxu1 %v1175_v0  ;;  %vm578_vm1 = vcmp.eq.f32.partialorder %v108_v42, 0.0 }
  0x95   :  { %920 = vmatpush3.bf16.msra.mxu0 %v919_v20 }
  0x96   :  { %921 = vmatprep.subr.bf16.mxu0 %v1175_v0 }
  0x97   :  { %944 = vmatpush3.bf16.msra.mxu1 %v943_v44 }
  0x98   :  { %945 = vmatprep.subr.bf16.mxu1 %v1175_v0 }
  0x99   :  { %923 = vmatpush3.bf16.msra.mxu0 %v922_v23  ;;  %v976_v23 = vpack.c.bf16 %v497_v22, %v496_v21 }
  0x9a   :  { %924 = vmatprep.subr.bf16.mxu0 %v1175_v0 }
  0x9b   :  { %947 = vmatpush3.bf16.msra.mxu1 %v946_v47 }
  0x9c   :  { %948 = vmatprep.subr.bf16.mxu1 %v1175_v0 }
  0x9d   :  { %926 = vmatpush3.bf16.msra.mxu0 %v925_v26  ;;  %v979_v26 = vpack.c.bf16 %v499_v25, %v498_v24 }
  0x9e   :  { %927 = vmatprep.subr.bf16.mxu0 %v1175_v0 }
  0x9f   :  { %950 = vmatpush3.bf16.msra.mxu1 %v949_v50 }
  0xa0   :  { %951 = vmatprep.subr.bf16.mxu1 %v1175_v0 }
  0xa1   :  { %929 = vmatpush3.bf16.msra.mxu0 %v928_v29  ;;  %v982_v29 = vpack.c.bf16 %v501_v28, %v500_v27 }
  0xa2   :  { %930 = vmatprep.subr.bf16.mxu0 %v1175_v0 }
  0xa3   :  { %953 = vmatpush3.bf16.msra.mxu1 %v952_v53  ;;  %v589_v53 = vlaneseq }
  0xa4   :  { %954 = vmatprep.subr.bf16.mxu1 %v1175_v0 }
  0xa5   :  { %932 = vmatpush3.bf16.msra.mxu0 %v931_v32  ;;  %v590_v54 = vand.u32 127, %v589_v53 }
  0xa6   :  { %933 = vmatprep.subr.bf16.mxu0 %v1175_v0 }
  0xa7   :  { %956 = vmatpush3.bf16.msra.mxu1 %v955_v56  ;;  %vm591_vm2 = vcmp.eq.s32.totalorder %v590_v54, 64 }
  0xa8   :  { %957 = vmatprep.subr.bf16.mxu1 %v1175_v0 }
  0xa9   :  { %935 = vmatpush3.bf16.msra.mxu0 %v934_v35  ;;  %v502_v35 = vld [vmem:[#allocation11 + $0x70] sm:$0xff] }
  0xaa   :  { %936 = vmatprep.subr.bf16.mxu0 %v1175_v0  ;;  %v985_v37 = vpack.c.bf16 %v503_v36, %v502_v35 }
  0xab   :  { %959 = vmatpush3.bf16.msra.mxu1 %v958_v59 }
  0xac   :  { %960 = vmatprep.subr.bf16.mxu1 %v1175_v0 }
  0xad   :  { %938 = vmatpush3.bf16.msra.mxu0 %v937_v38  ;;  %v614_v38 = vld [vmem:[%s1373_s6 + $0x2] ss:$0 sm:$0xff]  ;;  %s1135_s6 = scalar_lea.vmem %s601_s30, 128 }
  0xae   :  { %963 = vmatprep.subr.bf16.mxu0 %v1175_v0  ;;  %p1136_p6 = scmp.ne.s32.totalorder %s601_s30, %s1135_s6  ;;  %p1141_p8 = scmp.lt.s32.totalorder %s1135_s6, %s1135_s6 }
  0xaf   :  { %962 = vmatpush3.bf16.msra.mxu1 %v961_v9 }
  0xb0   :  { %p1142_p9 = por %p1141_p8, %p1140_p7 }
  0xb2   :  { %p1143_p10 = pnand %p1142_p9, %p1136_p6 }
 0x163   :  { %v648_v60 = vpop.f32.mrb[0].mxu0 }
 0x164   :  { %v649_v61 = vpop.f32.mrb[1].mxu0 }
 0x165   :  { %v650_v63 = vadd.f32 %v649_v61, %v648_v60  ;;  %v301_v2 = vpop.f32.mrb[0].mxu1 }
 0x166   :  { %v753_v3 = vpop.f32.mrb[1].mxu1 }
 0x167   :  { %v232_v4 = vadd.f32 %v650_v63, %v612_v62 }
 0x169   :  { %v302_v5 = vadd.f32 %v301_v2, %v232_v4 }
 0x16b   :  { %v305_v6 = vmax.f32 %v302_v5, 0.0 }
 0x16d   :  { %787 = vmatmul.mubr.f32.vlgmr.msra.gmra.mrb[2].mxu0 %v305_v6 }
 0x16e   :  { %856 = vmatprep.mubr.msk.f32.mxu0 %vm1176_vm0, %v1177_v1  ;;  %965 = vmatpush3.bf16.msra.mxu0 %v964_v13  ;;  %v494_v1 = vld [vmem:[#allocation11 + $0x30] sm:$0xff] }
 0x16f   :  { %966 = vmatprep.subr.bf16.mxu0 %v1175_v0  ;;  %v973_v20 = vpack.c.bf16 %v495_v19, %v494_v1 }
 0x172   :  { %968 = vmatpush3.bf16.msra.mxu0 %v967_v15 }
 0x173   :  { %969 = vmatprep.subr.bf16.mxu0 %v1175_v0 }
 0x176   :  { %971 = vmatpush3.bf16.msra.mxu0 %v970_v18 }
 0x177   :  { %972 = vmatprep.subr.bf16.mxu0 %v1175_v0 }
 0x17a   :  { %974 = vmatpush3.bf16.msra.mxu0 %v973_v20 }
 0x17b   :  { %975 = vmatprep.subr.bf16.mxu0 %v1175_v0 }
 0x17e   :  { %977 = vmatpush3.bf16.msra.mxu0 %v976_v23 }
 0x17f   :  { %978 = vmatprep.subr.bf16.mxu0 %v1175_v0 }
 0x182   :  { %980 = vmatpush3.bf16.msra.mxu0 %v979_v26 }
 0x183   :  { %981 = vmatprep.subr.bf16.mxu0 %v1175_v0 }
 0x186   :  { %983 = vmatpush3.bf16.msra.mxu0 %v982_v29 }
 0x187   :  { %984 = vmatprep.subr.bf16.mxu0 %v1175_v0 }
 0x18a   :  { %986 = vmatpush3.bf16.msra.mxu0 %v985_v37 }
 0x240   :  { %v392_v31 = vpop.f32.mrb[2].mxu0 }
 0x241   :  { %v393_v32 = vadd.f32 %v613_v30, %v392_v31  ;;  %v788_v33 = vpop.f32.mrb[3].mxu0 }
 0x243   :  { %v396_v34 = vmax.f32 %v393_v32, 0.0 }
 0x245   :  { %822 = vmatmul.mubr.f32.vlgmr.msra.gmra.mrb[2].mxu1 %v396_v34 }
 0x318   :  { %v483_v39 = vpop.f32.mrb[2].mxu1 }
 0x319   :  { %v484_v40 = vadd.f32 %v614_v38, %v483_v39  ;;  %v823_v0 = vpop.f32.mrb[3].mxu1 }
 0x31b   :  { %v487_v41 = vmax.f32 %v484_v40, 0.0 }
 0x31d   :  { %857 = vmatmul.mubr.f32.vlgmr.msra.gmra.mrb[4].mxu0 %v487_v41 }
 0x3f0   :  { %v574_v44 = vpop.f32.mrb[4].mxu0 }
 0x3f1   :  { %v575_v45 = vadd.f32 %v615_v43, %v574_v44  ;;  %v858_v46 = vpop.f32.mrb[5].mxu0 }
 0x3f3   :  { %v579_v47 = vsel %vm578_vm1, -1e+09, %v575_v45 }
 0x3f4   :  { %580 = vmax.xlane.f32.xlu0 %v579_v47 }
 0x481   :  { %v581_v48 = vpop.xlane.xlu0 %580 }
 0x482   :  { %v582_v49 = vsub.f32 %v579_v47, %v581_v48 }
 0x484   :  { %v583_v50 = vmul.f32 1.442695, %v582_v49 }
 0x486   :  { %999 = vpow2.f32 %v583_v50 }
 0x490   :  { %v1000_v51 = vpop.eup %999 }
 0x491   :  { %585 = vadd.xlane.f32.xlu0 %v1000_v51 }
 0x51e   :  { %v586_v52 = vpop.xlane.xlu0 %585 }
 0x51f   :  { %1001 = vrcp.f32 %v586_v52 }
 0x529   :  { %v1002_v55 = vpop.eup %1001 }
 0x52a   :  { %v588_v56 = vmul.f32 %v1002_v55, %v1000_v51 }
 0x52c   :  { %v592_v57 = vsel %vm591_vm2, %v575_v45, %v588_v56 }
 0x52d   :  { %593 = vst [vmem:[#allocation13] sm:$0xff] %v592_v57 }
 0x52e   :  { %1146 = shalt.err (!%p1143_p10)
}
 0x52f   :  { %s1147_s10 = scalar_lea.hbm %s1374_s7, 128 }
 0x530   :  { %p1148_p11 = scmp.ne.s32.totalorder %s1374_s7, %s1147_s10  ;;  %p1151_p12 = scmp.lt.u32.totalorder %s1147_s10, %s1374_s7 }
 0x532   :  { %p1153_p13 = pnand %p1151_p12, %p1148_p11 }
 0x534   :  { %1156 = shalt.err (!%p1153_p13)
}
 0x535   :  { %603 = dma.vmem_to_hbm [thread:$0]  %s601_s30, 128, %s1374_s7, [#allocation4]  }
 0x536   :  { %1165 = dma.done.wait [#allocation4], 128  }
 0x537   :  { %1166 = vsyncadd [#allocation4], 4294967168 }
 0x538   :  { %607 = vsyncpa [#allocation3], 1 }
 0x539   :  { %608 = vsyncpa [#allocation6], 1 }
 0x53a   :  { %609 = vsyncpa [#allocation9], 1 }
 0x53b   :  { %610 = vsyncpa [#allocation12], 1 }
 0x53c   :  { %611 = vsyncpa [#allocation4], 1 }

</bundles_post_ra>
